<compile_context>
chip_gen: v5e
topology: v5e:2x2
jax: 0.10.0
libtpu: 0.0.40
codegen_flags: <defaults>
</compile_context>

<pallas_src>
import jax
import jax.numpy as jnp
from jax import lax
from jax.experimental import pallas as pl
from jax.experimental.pallas import tpu as pltpu

F_LANE = 128  # padded lane width for the hidden feature axis / weight tiles


def mlp_kernel(x_ref, w1_ref, b1_ref, w2_ref, b2_ref,
               predict_ref, h_ref, xp_ref):
    nin = x_ref.shape[1]          # 41
    nh = h_ref.shape[1]           # 50
    nout = predict_ref.shape[1]   # 5

    # In-kernel zero-pad of x from nin -> 128 lanes (VMEM-only traffic, cheap).
    # Zero the whole scratch every step so padding lanes are guaranteed clean
    # regardless of which TensorCore executes which grid steps.
    xp_ref[...] = jnp.zeros_like(xp_ref)
    xp_ref[:, :nin] = x_ref[...]

    # Hidden layer: H = relu(X @ W1 + b1).  Padded W1 columns / b1 lanes are
    # zero, so h lanes [nh:128) are exactly zero after the relu.
    h = jnp.dot(xp_ref[...], w1_ref[...],
                preferred_element_type=jnp.float32,
                precision=lax.Precision.HIGHEST)
    h = jnp.maximum(h + b1_ref[...], 0.0)

    # Output layer: predict = H @ W2 + b2.  W2 rows [nh:128) and b2 lanes
    # [nout:128) are zero, so only lanes [0:nout) of p carry data.
    p = jnp.dot(h, w2_ref[...],
                preferred_element_type=jnp.float32,
                precision=lax.Precision.HIGHEST)
    p = p + b2_ref[...]

    h_ref[...] = h[:, :nh].astype(h_ref.dtype)
    predict_ref[...] = p[:, :nout].astype(predict_ref.dtype)


def _round_up(a, m):
    return (a + m - 1) // m * m


def mlp_forward(x, w1, b1, w2, b2, *, tb_max=2048):
    """x: (B, 41). Returns (predict (B, 5), H (B, 50)), both float32."""
    B, num_inputs = x.shape
    num_hiddens = w1.shape[1]
    num_outputs = w2.shape[1]
    assert num_inputs <= F_LANE and num_hiddens <= F_LANE and num_outputs <= F_LANE

    f32 = jnp.float32

    # Batch tile: multiple of 8, capped at tb_max, and >= 2 grid steps whenever
    # B allows it so the "parallel" batch axis can shard across 2 TCs (v7x).
    tb = min(tb_max, max(8, _round_up(pl.cdiv(B, 2), 8)))
    grid = (pl.cdiv(B, tb),)

    # Tiny, one-time wrapper-side weight padding (pure layout; negligible HBM).
    w1_pad = (jnp.zeros((F_LANE, F_LANE), f32)
              .at[:num_inputs, :num_hiddens].set(w1.astype(f32)))
    b1_pad = jnp.zeros((1, F_LANE), f32).at[0, :num_hiddens].set(b1.astype(f32))
    w2_pad = (jnp.zeros((F_LANE, F_LANE), f32)
              .at[:num_hiddens, :num_outputs].set(w2.astype(f32)))
    b2_pad = jnp.zeros((1, F_LANE), f32).at[0, :num_outputs].set(b2.astype(f32))

    predict, H = pl.pallas_call(
        mlp_kernel,
        out_shape=(
            jax.ShapeDtypeStruct((B, num_outputs), f32),   # predict
            jax.ShapeDtypeStruct((B, num_hiddens), f32),   # H
        ),
        grid=grid,
        in_specs=[
            pl.BlockSpec((tb, num_inputs), lambda i: (i, 0)),     # x (native 41 lanes)
            pl.BlockSpec((F_LANE, F_LANE), lambda i: (0, 0)),     # W1 (resident)
            pl.BlockSpec((1, F_LANE), lambda i: (0, 0)),          # b1 (resident)
            pl.BlockSpec((F_LANE, F_LANE), lambda i: (0, 0)),     # W2 (resident)
            pl.BlockSpec((1, F_LANE), lambda i: (0, 0)),          # b2 (resident)
        ],
        out_specs=(
            pl.BlockSpec((tb, num_outputs), lambda i: (i, 0)),    # predict
            pl.BlockSpec((tb, num_hiddens), lambda i: (i, 0)),    # H
        ),
        scratch_shapes=[pltpu.VMEM((tb, F_LANE), f32)],           # padded-x slab
        compiler_params=pltpu.CompilerParams(
            dimension_semantics=("parallel",)),
    )(x.astype(f32), w1_pad, b1_pad, w2_pad, b2_pad)

    return predict, H


def init_params(key):
    """Deterministic init mimicking PyTorch nn.Linear default U(-1/sqrt(fan_in), +)."""
    num_inputs, num_hiddens, num_outputs = 41, 50, 5
    k1, k2, k3, k4 = jax.random.split(key, 4)

    bound1 = 1.0 / jnp.sqrt(num_inputs)
    w1 = jax.random.uniform(k1, (num_inputs, num_hiddens), jnp.float32,
                            -bound1, bound1)
    b1 = jax.random.uniform(k2, (num_hiddens,), jnp.float32, -bound1, bound1)

    bound2 = 1.0 / jnp.sqrt(num_hiddens)
    w2 = jax.random.uniform(k3, (num_hiddens, num_outputs), jnp.float32,
                            -bound2, bound2)
    b2 = jax.random.uniform(k4, (num_outputs,), jnp.float32, -bound2, bound2)
    return w1, b1, w2, b2


def _reference(x, w1, b1, w2, b2):
    h = jnp.maximum(
        jnp.dot(x, w1, precision=lax.Precision.HIGHEST) + b1, 0.0)
    p = jnp.dot(h, w2, precision=lax.Precision.HIGHEST) + b2
    return p, h


if __name__ == "__main__":
    key = jax.random.PRNGKey(0)
    k_x, k_x2, k_p = jax.random.split(key, 3)
    w1, b1, w2, b2 = init_params(k_p)

    # Small-shape check (single grid step).
    B = 8
    x = jax.random.normal(k_x, (B, 41), jnp.float32)
    predict, H = mlp_forward(x, w1, b1, w2, b2)
    jax.block_until_ready((predict, H))

    predict_ref, H_ref = _reference(x, w1, b1, w2, b2)
    assert predict.shape == (B, 5) and H.shape == (B, 50)
    assert jnp.allclose(H, H_ref, atol=1e-5, rtol=1e-5)
    assert jnp.allclose(predict, predict_ref, atol=1e-5, rtol=1e-5)

    # Multi-tile check: batch grid + pipelining + ragged last tile (200 = 3*64 + 8).
    B2 = 200
    x2 = jax.random.normal(k_x2, (B2, 41), jnp.float32)
    predict2, H2 = mlp_forward(x2, w1, b1, w2, b2, tb_max=64)
    jax.block_until_ready((predict2, H2))

    predict2_ref, H2_ref = _reference(x2, w1, b1, w2, b2)
    assert predict2.shape == (B2, 5) and H2.shape == (B2, 50)
    assert jnp.allclose(H2, H2_ref, atol=1e-5, rtol=1e-5)
    assert jnp.allclose(predict2, predict2_ref, atol=1e-5, rtol=1e-5)

    print("KERNEL_OK")
</pallas_src>

<mosaic_0001>
module attributes {stable_mosaic.version = 11 : i64} {
  func.func @mlp_kernel(%arg0: i32, %arg1: memref<8x41xf32, #tpu.memory_space<vmem>>, %arg2: memref<128x128xf32, #tpu.memory_space<vmem>>, %arg3: memref<1x128xf32, #tpu.memory_space<vmem>>, %arg4: memref<128x128xf32, #tpu.memory_space<vmem>>, %arg5: memref<1x128xf32, #tpu.memory_space<vmem>>, %arg6: memref<8x5xf32, #tpu.memory_space<vmem>>, %arg7: memref<8x50xf32, #tpu.memory_space<vmem>>, %arg8: memref<8x128xf32, #tpu.memory_space<vmem>>) attributes {dimension_semantics = [#tpu.dimension_semantics<parallel>], iteration_bounds = array<i64: 1>, scalar_prefetch = 0 : i64, scratch_operands = 1 : i64, tpu.core_type = #tpu.core_type<tc>, window_params = [{transform_indices = @transform_0, window_bounds = array<i64: 8, 41>}, {pipeline_mode = #tpu.pipeline_mode<synchronous>, transform_indices = @transform_1, window_bounds = array<i64: 128, 128>}, {pipeline_mode = #tpu.pipeline_mode<synchronous>, transform_indices = @transform_2, window_bounds = array<i64: 1, 128>}, {pipeline_mode = #tpu.pipeline_mode<synchronous>, transform_indices = @transform_3, window_bounds = array<i64: 128, 128>}, {pipeline_mode = #tpu.pipeline_mode<synchronous>, transform_indices = @transform_4, window_bounds = array<i64: 1, 128>}, {transform_indices = @transform_5, window_bounds = array<i64: 8, 5>}, {transform_indices = @transform_6, window_bounds = array<i64: 8, 50>}]} {
    %cst = arith.constant 0.000000e+00 : f32
    %0 = vector.broadcast %cst : f32 to vector<8x128xf32>
    %c0 = arith.constant 0 : index
    %c0_0 = arith.constant 0 : index
    %1 = vector.load %arg8[%c0, %c0_0] : memref<8x128xf32, #tpu.memory_space<vmem>>, vector<8x128xf32>
    tpu.vector_store %arg8[%c0, %c0_0], %0 {strides = array<i32>} : memref<8x128xf32, #tpu.memory_space<vmem>>, vector<8x128xf32>,
    %c0_1 = arith.constant 0 : index
    %c0_2 = arith.constant 0 : index
    %2 = vector.load %arg1[%c0_1, %c0_2] : memref<8x41xf32, #tpu.memory_space<vmem>>, vector<8x41xf32>
    %c0_3 = arith.constant 0 : index
    %c0_4 = arith.constant 0 : index
    %3 = vector.load %arg8[%c0_3, %c0_4] : memref<8x128xf32, #tpu.memory_space<vmem>>, vector<8x41xf32>
    tpu.vector_store %arg8[%c0_3, %c0_4], %2 {strides = array<i32>} : memref<8x128xf32, #tpu.memory_space<vmem>>, vector<8x41xf32>,
    %c0_5 = arith.constant 0 : index
    %c0_6 = arith.constant 0 : index
    %4 = vector.load %arg8[%c0_5, %c0_6] : memref<8x128xf32, #tpu.memory_space<vmem>>, vector<8x128xf32>
    %c0_7 = arith.constant 0 : index
    %c0_8 = arith.constant 0 : index
    %5 = vector.load %arg2[%c0_7, %c0_8] : memref<128x128xf32, #tpu.memory_space<vmem>>, vector<128x128xf32>
    %cst_9 = arith.constant dense<0.000000e+00> : vector<8x128xf32>
    %6 = tpu.matmul %4, %5, %cst_9 {dimension_numbers = #tpu.dot_dimension_numbers<[1], [0], [0], [1], [0, 0, 1, 1], [], []>, precision = #tpu.contract_precision<fp32>} : vector<8x128xf32>, vector<128x128xf32>, vector<8x128xf32> -> vector<8x128xf32>
    %c0_10 = arith.constant 0 : index
    %c0_11 = arith.constant 0 : index
    %7 = vector.load %arg3[%c0_10, %c0_11] : memref<1x128xf32, #tpu.memory_space<vmem>>, vector<1x128xf32>
    %8 = vector.broadcast %7 : vector<1x128xf32> to vector<8x128xf32>
    %9 = arith.addf %6, %8 : vector<8x128xf32>
    %cst_12 = arith.constant 0.000000e+00 : f32
    %10 = vector.broadcast %cst_12 : f32 to vector<8x128xf32>
    %11 = arith.maximumf %9, %10 : vector<8x128xf32>
    %c0_13 = arith.constant 0 : index
    %c0_14 = arith.constant 0 : index
    %12 = vector.load %arg4[%c0_13, %c0_14] : memref<128x128xf32, #tpu.memory_space<vmem>>, vector<128x128xf32>
    %cst_15 = arith.constant dense<0.000000e+00> : vector<8x128xf32>
    %13 = tpu.matmul %11, %12, %cst_15 {dimension_numbers = #tpu.dot_dimension_numbers<[1], [0], [0], [1], [0, 0, 1, 1], [], []>, precision = #tpu.contract_precision<fp32>} : vector<8x128xf32>, vector<128x128xf32>, vector<8x128xf32> -> vector<8x128xf32>
    %c0_16 = arith.constant 0 : index
    %c0_17 = arith.constant 0 : index
    %14 = vector.load %arg5[%c0_16, %c0_17] : memref<1x128xf32, #tpu.memory_space<vmem>>, vector<1x128xf32>
    %15 = vector.broadcast %14 : vector<1x128xf32> to vector<8x128xf32>
    %16 = arith.addf %13, %15 : vector<8x128xf32>
    %17 = vector.extract_strided_slice %11 {offsets = [0, 0], sizes = [8, 50], strides = [1, 1]} : vector<8x128xf32> to vector<8x50xf32>
    %c0_18 = arith.constant 0 : index
    %c0_19 = arith.constant 0 : index
    %18 = vector.load %arg7[%c0_18, %c0_19] : memref<8x50xf32, #tpu.memory_space<vmem>>, vector<8x50xf32>
    tpu.vector_store %arg7[%c0_18, %c0_19], %17 {strides = array<i32>} : memref<8x50xf32, #tpu.memory_space<vmem>>, vector<8x50xf32>,
    %19 = vector.extract_strided_slice %16 {offsets = [0, 0], sizes = [8, 5], strides = [1, 1]} : vector<8x128xf32> to vector<8x5xf32>
    %c0_20 = arith.constant 0 : index
    %c0_21 = arith.constant 0 : index
    %20 = vector.load %arg6[%c0_20, %c0_21] : memref<8x5xf32, #tpu.memory_space<vmem>>, vector<8x5xf32>
    tpu.vector_store %arg6[%c0_20, %c0_21], %19 {strides = array<i32>} : memref<8x5xf32, #tpu.memory_space<vmem>>, vector<8x5xf32>,
    return
  }
  func.func @transform_0(%arg0: i32) -> (i32, i32) {
    %c0_i32 = arith.constant 0 : i32
    %c0_i32_0 = arith.constant 0 : i32
    return %arg0, %c0_i32 : i32, i32
  }
  func.func @transform_1(%arg0: i32) -> (i32, i32) {
    %c0_i32 = arith.constant 0 : i32
    %c0_i32_0 = arith.constant 0 : i32
    %c0_i32_1 = arith.constant 0 : i32
    return %c0_i32, %c0_i32_0 : i32, i32
  }
  func.func @transform_2(%arg0: i32) -> (i32, i32) {
    %c0_i32 = arith.constant 0 : i32
    %c0_i32_0 = arith.constant 0 : i32
    %c0_i32_1 = arith.constant 0 : i32
    return %c0_i32, %c0_i32_0 : i32, i32
  }
  func.func @transform_3(%arg0: i32) -> (i32, i32) {
    %c0_i32 = arith.constant 0 : i32
    %c0_i32_0 = arith.constant 0 : i32
    %c0_i32_1 = arith.constant 0 : i32
    return %c0_i32, %c0_i32_0 : i32, i32
  }
  func.func @transform_4(%arg0: i32) -> (i32, i32) {
    %c0_i32 = arith.constant 0 : i32
    %c0_i32_0 = arith.constant 0 : i32
    %c0_i32_1 = arith.constant 0 : i32
    return %c0_i32, %c0_i32_0 : i32, i32
  }
  func.func @transform_5(%arg0: i32) -> (i32, i32) {
    %c0_i32 = arith.constant 0 : i32
    %c0_i32_0 = arith.constant 0 : i32
    return %arg0, %c0_i32 : i32, i32
  }
  func.func @transform_6(%arg0: i32) -> (i32, i32) {
    %c0_i32 = arith.constant 0 : i32
    %c0_i32_0 = arith.constant 0 : i32
    return %arg0, %c0_i32 : i32, i32
  }
}

</mosaic_0001>

<bundles_post_ra>
// kernel: tpu_custom_call.1
= control target key start
LH: loop header
LB: loop body
LE: loop exit
PB: predicated region body
PF: predicated region fallthrough
CT: control target
= control target key end

     0   :  { %12 = vsyncpa [#allocation4], 0  ;;  %s1523_s0 = inlined_call_operand.hbm [shape: f32[8,41], index: 0, kind: input, shape index: {}]   ;;  %s1524_s1 = inlined_call_operand.hbm [shape: f32[128,128], index: 1, kind: input, shape index: {}]   ;;  %s1525_s2 = inlined_call_operand.vmem [shape: f32[1,128], index: 2, kind: input, shape index: {}]   ;;  %s1526_s3 = inlined_call_operand.hbm [shape: f32[128,128], index: 3, kind: input, shape index: {}]   ;;  %s1527_s4 = inlined_call_operand.vmem [shape: f32[1,128], index: 4, kind: input, shape index: {}]   ;;  %s1528_s5 = inlined_call_operand.hbm [shape: f32[8,5], index: 5, kind: output, shape index: {0}]   ;;  %s1529_s6 = inlined_call_operand.hbm [shape: f32[8,50], index: 6, kind: output, shape index: {1}]  }
   0x1   :  { %13 = vsyncpa [#allocation7], 0 }
   0x2   :  { %14 = vsyncpa [#allocation5], 0  ;;  %s31_s23 = sshll.u32 %s1524_s1, 4  ;;  %s32_s23 = int_to_ptr.hbm [resolvable:$true] %s31_s23 }
   0x3   :  { %15 = vsyncpa [#allocation11], 0  ;;  %s973_s24 = smov [#allocation6]   ;;  %s21_s28 = sshll.u32 %s1523_s0, 4  ;;  %s22_s28 = int_to_ptr.hbm [resolvable:$true] %s21_s28 }
   0x4   :  { %s33_s25 = sshll.u32 %s973_s24, 4  ;;  %s974_s29 = smov 128   ;;  %s34_s25 = int_to_ptr.vmem [resolvable:$true] %s33_s25 }
   0x5   :  { %s975_s30 = smov 8   ;;  %s976_s7 = smov [#allocation3]  }
   0x6   :  { %39 = dma.hbm_to_vmem [thread:$0]  %s32_s23, 2048, %s34_s25, [#allocation7], %s974_s29, %s974_s29, %s975_s30  }
   0x7   :  { %s23_s8 = sshll.u32 %s976_s7, 4  ;;  %s46_s11 = sshll.u32 %s1526_s3, 4  ;;  %s24_s8 = int_to_ptr.vmem [resolvable:$true] %s23_s8  ;;  %s47_s11 = int_to_ptr.hbm [resolvable:$true] %s46_s11 }
   0x8   :  { %26 = dma.hbm_to_vmem [thread:$0]  %s22_s28, 128, %s24_s8, [#allocation4]  }
   0x9   :  { %s977_s1 = smov [#allocation8]  }
   0xa   :  { %s48_s12 = sshll.u32 %s977_s1, 4  ;;  %s49_s12 = int_to_ptr.vmem [resolvable:$true] %s48_s12 }
   0xb   :  { %54 = dma.hbm_to_vmem [thread:$0]  %s47_s11, 2048, %s49_s12, [#allocation7], %s974_s29, %s974_s29, %s975_s30  }
   0xc   :  { %965 = dma.done.wait [#allocation4], 128  }
   0xd   :  { %966 = vsyncadd [#allocation4], 4294967168 }
   0xe   :  { %967 = dma.done.wait [#allocation7], 4096  }
   0xf   :  { %968 = vsyncadd [#allocation7], 4294963200  ;;  %v89_v0 = vld [vmem:[#allocation6 + $0x78] sm:$0xff]  ;;  %v88_v1 = vld [vmem:[#allocation6 + $0x70] sm:$0xff]  ;;  %vm71_vm0 = vcmask 334848   ;;  %vm797_vm1 = vcmask 408576  }
  0x10   :  { %v87_v2 = vld [vmem:[#allocation6 + $0x68] sm:$0xff]  ;;  %v1025_v3 = vand.u32 4294901760, %v89_v0  ;;  %v1027_v4 = vand.u32 4294901760, %v88_v1  ;;  %v86_v6 = vld [vmem:[#allocation6 + $0x60] sm:$0xff]  ;;  %v85_v7 = vld [vmem:[#allocation6 + $0x58] sm:$0xff]  ;;  %s819_s16 = sshll.u32 %s1529_s6, 4  ;;  %s820_s16 = int_to_ptr.hbm [resolvable:$true] %s819_s16 }
  0x11   :  { %v1029_v5 = vand.u32 4294901760, %v87_v2  ;;  %v84_v8 = vld [vmem:[#allocation6 + $0x50] sm:$0xff]  ;;  %v1031_v9 = vand.u32 4294901760, %v86_v6  ;;  %v1033_v10 = vand.u32 4294901760, %v85_v7  ;;  %v83_v12 = vld [vmem:[#allocation6 + $0x48] sm:$0xff]  ;;  %v82_v13 = vld [vmem:[#allocation6 + $0x40] sm:$0xff] }
  0x12   :  { %v1035_v11 = vand.u32 4294901760, %v84_v8  ;;  %95 = vmatpush.msra.mxu0 %v1025_v3  ;;  %v1039_v14 = vsub.f32 %v89_v0, %v1025_v3  ;;  %v1042_v15 = vsub.f32 %v88_v1, %v1027_v4  ;;  %v1047_v17 = vand.u32 4294901760, %v83_v12  ;;  %291 = vmatpush.msra.mxu3 %v1025_v3  ;;  %v81_v21 = vld [vmem:[#allocation6 + $0x38] sm:$0xff]  ;;  %v80_v34 = vld [vmem:[#allocation6 + $0x30] sm:$0xff]  ;;  %v79_v35 = vld [vmem:[#allocation6 + $0x28] sm:$0xff]  ;;  %s980_s19 = smov [#allocation9]  }
  0x13   :  { %v1045_v16 = vsub.f32 %v87_v2, %v1029_v5  ;;  %v1051_v18 = vsub.f32 %v86_v6, %v1031_v9  ;;  %v1054_v19 = vsub.f32 %v85_v7, %v1033_v10  ;;  %v1056_v20 = vand.u32 4294901760, %v82_v13  ;;  %v78_v42 = vld [vmem:[#allocation6 + $0x20] sm:$0xff]  ;;  %v77_v48 = vld [vmem:[#allocation6 + $0x18] sm:$0xff]  ;;  %v76_v53 = vld [vmem:[#allocation6 + $0x10] sm:$0xff]  ;;  %s806_s20 = sshll.u32 %s980_s19, 4  ;;  %s808_s22 = sshll.u32 %s1528_s5, 4  ;;  %s807_s20 = int_to_ptr.vmem [resolvable:$true] %s806_s20  ;;  %s809_s22 = int_to_ptr.hbm [resolvable:$true] %s808_s22 }
  0x14   :  { %97 = vmatpush.msra.mxu0 %v1027_v4  ;;  %v137_v22 = vand.u32 4294901760, %v1039_v14  ;;  %v143_v23 = vand.u32 4294901760, %v1042_v15  ;;  %v1063_v25 = vsub.f32 %v84_v8, %v1035_v11  ;;  %238 = vmatpush.msra.mxu2 %v1039_v14  ;;  %v1069_v28 = vsub.f32 %v83_v12, %v1047_v17  ;;  %v75_v59 = vld [vmem:[#allocation6 + $0x8] sm:$0xff]  ;;  %v74_v6 = vld [vmem:[#allocation6] sm:$0xff] }
  0x15   :  { %v149_v24 = vand.u32 4294901760, %v1045_v16  ;;  %v155_v26 = vand.u32 4294901760, %v1051_v18  ;;  %v161_v27 = vand.u32 4294901760, %v1054_v19  ;;  %293 = vmatpush.msra.mxu3 %v1027_v4  ;;  %v1082_v32 = vand.u32 4294901760, %v81_v21 }
  0x16   :  { %v138_v29 = vsub.f32 %v1039_v14, %v137_v22  ;;  %99 = vmatpush.msra.mxu0 %v1029_v5  ;;  %v144_v30 = vsub.f32 %v1042_v15, %v143_v23  ;;  %241 = vmatpush.msra.mxu2 %v1042_v15  ;;  %v1086_v33 = vsub.f32 %v82_v13, %v1056_v20  ;;  %v167_v39 = vand.u32 4294901760, %v1063_v25  ;;  %v70_v13 = vld [vmem:[#allocation3] sm:$0xff]  ;;  %v450_v15 = vld [vmem:[#allocation8 + $0x70] sm:$0xff] }
  0x17   :  { %v150_v31 = vsub.f32 %v1045_v16, %v149_v24  ;;  %295 = vmatpush.msra.mxu3 %v1029_v5  ;;  %v156_v38 = vsub.f32 %v1051_v18, %v155_v26  ;;  %v162_v40 = vsub.f32 %v1054_v19, %v161_v27  ;;  %v173_v41 = vand.u32 4294901760, %v1069_v28 }
  0x18   :  { %v139_v36 = vand.u32 4294901760, %v138_v29  ;;  %v145_v37 = vand.u32 4294901760, %v144_v30  ;;  %101 = vmatpush.msra.mxu0 %v1031_v9  ;;  %244 = vmatpush.msra.mxu2 %v1045_v16  ;;  %v1101_v44 = vand.u32 4294901760, %v80_v34  ;;  %v1104_v45 = vsub.f32 %v81_v21, %v1082_v32 }
  0x19   :  { %297 = vmatpush.msra.mxu3 %v1031_v9  ;;  %v151_v43 = vand.u32 4294901760, %v150_v31  ;;  %v1106_v46 = vand.u32 4294901760, %v79_v35  ;;  %v179_v47 = vand.u32 4294901760, %v1086_v33  ;;  %v157_v49 = vand.u32 4294901760, %v156_v38 }
  0x1a   :  { %140 = vmatpush.msra.mxu1 %v139_v36  ;;  %103 = vmatpush.msra.mxu0 %v1033_v10  ;;  %v168_v50 = vsub.f32 %v1063_v25, %v167_v39  ;;  %v1116_v51 = vsub.f32 %v80_v34, %v1101_v44  ;;  %v1118_v52 = vand.u32 4294901760, %v78_v42  ;;  %v174_v54 = vsub.f32 %v1069_v28, %v173_v41 }
  0x1b   :  { %247 = vmatpush.msra.mxu2 %v1051_v18  ;;  %299 = vmatpush.msra.mxu3 %v1033_v10  ;;  %v163_v55 = vand.u32 4294901760, %v162_v40  ;;  %v185_v56 = vand.u32 4294901760, %v1104_v45  ;;  %v1128_v57 = vsub.f32 %v79_v35, %v1106_v46  ;;  %v1130_v58 = vand.u32 4294901760, %v77_v48  ;;  %v446_v18 = vld [vmem:[#allocation8 + $0x50] sm:$0xff] }
  0x1c   :  { %146 = vmatpush.msra.mxu1 %v145_v37  ;;  %105 = vmatpush.msra.mxu0 %v1035_v11  ;;  %v180_v60 = vsub.f32 %v1086_v33, %v179_v47  ;;  %v1135_v61 = vand.u32 4294901760, %v76_v53  ;;  %v169_v62 = vand.u32 4294901760, %v168_v50  ;;  %v191_v63 = vand.u32 4294901760, %v1116_v51 }
  0x1d   :  { %250 = vmatpush.msra.mxu2 %v1054_v19  ;;  %301 = vmatpush.msra.mxu3 %v1035_v11  ;;  %v1142_v0 = vsub.f32 %v78_v42, %v1118_v52  ;;  %v175_v1 = vand.u32 4294901760, %v174_v54  ;;  %v1144_v2 = vand.u32 4294901760, %v75_v59  ;;  %v186_v7 = vsub.f32 %v1104_v45, %v185_v56  ;;  %v444_v19 = vld [vmem:[#allocation8 + $0x40] sm:$0xff] }
  0x1e   :  { %152 = vmatpush.msra.mxu1 %v151_v43  ;;  %107 = vmatpush.msra.mxu0 %v1047_v17  ;;  %v197_v8 = vand.u32 4294901760, %v1128_v57  ;;  %v1154_v12 = vsub.f32 %v77_v48, %v1130_v58  ;;  %v181_v21 = vand.u32 4294901760, %v180_v60  ;;  %v1157_v29 = vsub.f32 %v76_v53, %v1135_v61 }
  0x1f   :  { %253 = vmatpush.msra.mxu2 %v1063_v25  ;;  %303 = vmatpush.msra.mxu3 %v1047_v17  ;;  %v978_v30 = vmov 0.0   ;;  %v192_v31 = vsub.f32 %v1116_v51, %v191_v63  ;;  %v203_v34 = vand.u32 4294901760, %v1142_v0  ;;  %v1166_v35 = vand.u32 4294901760, %v74_v6 }
  0x20   :  { %158 = vmatpush.msra.mxu1 %v157_v49  ;;  %109 = vmatpush.msra.mxu0 %v1056_v20  ;;  %69 = vst [vmem:[#allocation2] sm:$0xff] %v978_v30  ;;  %v187_v36 = vand.u32 4294901760, %v186_v7  ;;  %v198_v37 = vsub.f32 %v1128_v57, %v197_v8  ;;  %v209_v38 = vand.u32 4294901760, %v1154_v12  ;;  %v1176_v40 = vsub.f32 %v75_v59, %v1144_v2 }
  0x21   :  { %256 = vmatpush.msra.mxu2 %v1069_v28  ;;  %305 = vmatpush.msra.mxu3 %v1056_v20  ;;  %72 = vst.msk [vmem:[#allocation2] sm:$0xff] %vm71_vm0, %v70_v13  ;;  %v193_v42 = vand.u32 4294901760, %v192_v31  ;;  %v204_v43 = vsub.f32 %v1142_v0, %v203_v34  ;;  %v215_v48 = vand.u32 4294901760, %v1157_v29  ;;  %v1186_v49 = vsub.f32 %v74_v6, %v1166_v35 }
  0x22   :  { %164 = vmatpush.msra.mxu1 %v163_v55  ;;  %111 = vmatpush.msra.mxu0 %v1082_v32  ;;  %v199_v50 = vand.u32 4294901760, %v198_v37  ;;  %v210_v53 = vsub.f32 %v1154_v12, %v209_v38  ;;  %v221_v54 = vand.u32 4294901760, %v1176_v40  ;;  %v1233_v16 = vand.u32 4294901760, %v450_v15 }
  0x23   :  { %259 = vmatpush.msra.mxu2 %v1086_v33  ;;  %307 = vmatpush.msra.mxu3 %v1082_v32  ;;  %v205_v55 = vand.u32 4294901760, %v204_v43  ;;  %v216_v59 = vsub.f32 %v1157_v29, %v215_v48  ;;  %v227_v60 = vand.u32 4294901760, %v1186_v49  ;;  %v443_v33 = vld [vmem:[#allocation8 + $0x38] sm:$0xff]  ;;  %vm799_vm2 = vcmask 39936  }
  0x24   :  { %170 = vmatpush.msra.mxu1 %v169_v62  ;;  %113 = vmatpush.msra.mxu0 %v1101_v44  ;;  %v211_v6 = vand.u32 4294901760, %v210_v53  ;;  %v222_v7 = vsub.f32 %v1176_v40, %v221_v54  ;;  %v447_v53 = vld [vmem:[#allocation8 + $0x58] sm:$0xff] }
  0x25   :  { %262 = vmatpush.msra.mxu2 %v1104_v45  ;;  %309 = vmatpush.msra.mxu3 %v1101_v44  ;;  %v228_v30 = vsub.f32 %v1186_v49, %v227_v60  ;;  %v1310_v45 = vand.u32 4294901760, %v443_v33 }
  0x26   :  { %176 = vmatpush.msra.mxu1 %v175_v1  ;;  %115 = vmatpush.msra.mxu0 %v1106_v46 }
  0x27   :  { %265 = vmatpush.msra.mxu2 %v1116_v51  ;;  %311 = vmatpush.msra.mxu3 %v1106_v46  ;;  %v1325_v51 = vsub.f32 %v443_v33, %v1310_v45 }
  0x28   :  { %182 = vmatpush.msra.mxu1 %v181_v21  ;;  %117 = vmatpush.msra.mxu0 %v1118_v52  ;;  %v73_v62 = vld [vmem:[#allocation2] sm:$0xff]  ;;  %v217_v21 = vand.u32 4294901760, %v216_v59  ;;  %v1242_v59 = vand.u32 4294901760, %v446_v18 }
  0x29   :  { %268 = vmatpush.msra.mxu2 %v1128_v57  ;;  %313 = vmatpush.msra.mxu3 %v1118_v52  ;;  %v1204_v1 = vand.u32 4294901760, %v73_v62 }
  0x2a   :  { %188 = vmatpush.msra.mxu1 %v187_v36  ;;  %119 = vmatpush.msra.mxu0 %v1130_v58  ;;  %v223_v36 = vand.u32 4294901760, %v222_v7 }
  0x2b   :  { %271 = vmatpush.msra.mxu2 %v1142_v0  ;;  %315 = vmatpush.msra.mxu3 %v1130_v58  ;;  %v127_v13 = vsub.f32 %v73_v62, %v1204_v1  ;;  %v1251_v62 = vsub.f32 %v450_v15, %v1233_v16  ;;  %v437_v0 = vld [vmem:[#allocation8 + $0x8] sm:$0xff] }
  0x2c   :  { %194 = vmatpush.msra.mxu1 %v193_v42  ;;  %121 = vmatpush.msra.mxu0 %v1135_v61  ;;  %v229_v42 = vand.u32 4294901760, %v228_v30  ;;  %v1271_v30 = vand.u32 4294901760, %v444_v19 }
  0x2d   :  { %274 = vmatpush.msra.mxu2 %v1154_v12  ;;  %317 = vmatpush.msra.mxu3 %v1135_v61  ;;  %v128_v31 = vand.u32 4294901760, %v127_v13  ;;  %v436_v12 = vld [vmem:[#allocation8] sm:$0xff] }
  0x2e   :  { %200 = vmatpush.msra.mxu1 %v199_v50  ;;  %123 = vmatpush.msra.mxu0 %v1144_v2  ;;  %v448_v50 = vld [vmem:[#allocation8 + $0x60] sm:$0xff] }
  0x2f   :  { %277 = vmatpush.msra.mxu2 %v1157_v29  ;;  %319 = vmatpush.msra.mxu3 %v1144_v2  ;;  %v129_v37 = vsub.f32 %v127_v13, %v128_v31 }
  0x30   :  { %206 = vmatpush.msra.mxu1 %v205_v55  ;;  %125 = vmatpush.msra.mxu0 %v1166_v35  ;;  %v1240_v55 = vand.u32 4294901760, %v447_v53 }
  0x31   :  { %280 = vmatpush.msra.mxu2 %v1176_v40  ;;  %321 = vmatpush.msra.mxu3 %v1166_v35  ;;  %v130_v14 = vand.u32 4294901760, %v129_v37 }
  0x32   :  { %332 = vmatpush.msrb.mxu0 %v137_v22  ;;  %212 = vmatpush.msra.mxu1 %v211_v6  ;;  %v451_v22 = vld [vmem:[#allocation8 + $0x78] sm:$0xff] }
  0x33   :  { %283 = vmatpush.msra.mxu2 %v1186_v49  ;;  %325 = vmatmul.f32.vlgmr.msra.gmra.mxu3 %v128_v31  ;;  %v1231_v43 = vand.u32 4294901760, %v451_v22 }
  0x34   :  { %336 = vmatpush.msrb.mxu0 %v143_v23  ;;  %218 = vmatpush.msra.mxu1 %v217_v21  ;;  %v449_v23 = vld [vmem:[#allocation8 + $0x68] sm:$0xff] }
  0x35   :  { %286 = vmatmul.f32.vlgmr.msra.gmra.mxu2 %v127_v13  ;;  %131 = vmatmul.f32.vlgmr.msra.gmra.mxu0 %v130_v14  ;;  %v1299_v14 = vsub.f32 %v444_v19, %v1271_v30 }
  0x36   :  { %340 = vmatpush.msrb.mxu0 %v149_v24  ;;  %224 = vmatpush.msra.mxu1 %v223_v36  ;;  %v1235_v24 = vand.u32 4294901760, %v449_v23  ;;  %v1276_v36 = vsub.f32 %v446_v18, %v1242_v59 }
  0x37   :  { %457 = vmatpush.msrb.mxu2 %v1231_v43 }
  0x38   :  { %344 = vmatpush.msrb.mxu0 %v155_v26  ;;  %230 = vmatpush.msra.mxu1 %v229_v42  ;;  %v1238_v26 = vand.u32 4294901760, %v448_v50  ;;  %v1254_v6 = vsub.f32 %v449_v23, %v1235_v24 }
  0x39   :  { %232 = vmatmul.f32.vlgmr.msra.gmra.mxu1 %v1204_v1  ;;  %459 = vmatpush.msrb.mxu2 %v1233_v16 }
  0x3a   :  { %399 = vmatpush.msrb.mxu1 %v1025_v3  ;;  %348 = vmatpush.msrb.mxu0 %v161_v27  ;;  %v445_v3 = vld [vmem:[#allocation8 + $0x48] sm:$0xff]  ;;  %v1248_v27 = vsub.f32 %v451_v22, %v1231_v43  ;;  %v1259_v13 = vsub.f32 %v448_v50, %v1238_v26  ;;  %v511_v21 = vand.u32 4294901760, %v1254_v6  ;;  %v529_v50 = vand.u32 4294901760, %v1276_v36 }
  0x3b   :  { %v1256_v7 = vand.u32 4294901760, %v445_v3  ;;  %461 = vmatpush.msrb.mxu2 %v1235_v24  ;;  %v441_v22 = vld [vmem:[#allocation8 + $0x28] sm:$0xff] }
  0x3c   :  { %401 = vmatpush.msrb.mxu1 %v1027_v4  ;;  %352 = vmatpush.msrb.mxu0 %v167_v39  ;;  %v1263_v4 = vsub.f32 %v447_v53, %v1240_v55  ;;  %v499_v25 = vand.u32 4294901760, %v1248_v27  ;;  %v505_v39 = vand.u32 4294901760, %v1251_v62  ;;  %v517_v31 = vand.u32 4294901760, %v1259_v13  ;;  %v440_v53 = vld [vmem:[#allocation8 + $0x20] sm:$0xff] }
  0x3d   :  { %v512_v37 = vsub.f32 %v1254_v6, %v511_v21  ;;  %463 = vmatpush.msrb.mxu2 %v1238_v26  ;;  %v1318_v19 = vand.u32 4294901760, %v441_v22 }
  0x3e   :  { %403 = vmatpush.msrb.mxu1 %v1029_v5  ;;  %356 = vmatpush.msrb.mxu0 %v173_v41  ;;  %v500_v5 = vsub.f32 %v1248_v27, %v499_v25  ;;  %v506_v28 = vsub.f32 %v1251_v62, %v505_v39  ;;  %v1288_v41 = vsub.f32 %v445_v3, %v1256_v7 }
  0x3f   :  { %v518_v23 = vsub.f32 %v1259_v13, %v517_v31  ;;  %v513_v18 = vand.u32 4294901760, %v512_v37  ;;  %465 = vmatpush.msrb.mxu2 %v1240_v55 }
  0x40   :  { %405 = vmatpush.msrb.mxu1 %v1031_v9  ;;  %360 = vmatpush.msrb.mxu0 %v179_v47  ;;  %v523_v9 = vand.u32 4294901760, %v1263_v4  ;;  %v442_v47 = vld [vmem:[#allocation8 + $0x30] sm:$0xff]  ;;  %v501_v42 = vand.u32 4294901760, %v500_v5  ;;  %v507_v15 = vand.u32 4294901760, %v506_v28  ;;  %v530_v28 = vsub.f32 %v1276_v36, %v529_v50 }
  0x41   :  { %v519_v5 = vand.u32 4294901760, %v518_v23  ;;  %467 = vmatpush.msrb.mxu2 %v1242_v59 }
  0x42   :  { %407 = vmatpush.msrb.mxu1 %v1033_v10  ;;  %364 = vmatpush.msrb.mxu0 %v185_v56  ;;  %v535_v10 = vand.u32 4294901760, %v1288_v41  ;;  %v1312_v56 = vand.u32 4294901760, %v442_v47  ;;  %v524_v3 = vsub.f32 %v1263_v4, %v523_v9 }
  0x43   :  { %502 = vmatpush.msrb.mxu3 %v501_v42  ;;  %v547_v42 = vand.u32 4294901760, %v1325_v51  ;;  %469 = vmatpush.msrb.mxu2 %v1256_v7 }
  0x44   :  { %409 = vmatpush.msrb.mxu1 %v1035_v11  ;;  %368 = vmatpush.msrb.mxu0 %v191_v63  ;;  %v541_v11 = vand.u32 4294901760, %v1299_v14  ;;  %v439_v63 = vld [vmem:[#allocation8 + $0x18] sm:$0xff]  ;;  %v1332_v37 = vsub.f32 %v442_v47, %v1312_v56  ;;  %v536_v57 = vsub.f32 %v1288_v41, %v535_v10  ;;  %v525_v33 = vand.u32 4294901760, %v524_v3 }
  0x45   :  { %508 = vmatpush.msrb.mxu3 %v507_v15  ;;  %v1345_v47 = vsub.f32 %v441_v22, %v1318_v19  ;;  %v1347_v15 = vand.u32 4294901760, %v439_v63  ;;  %471 = vmatpush.msrb.mxu2 %v1271_v30 }
  0x46   :  { %411 = vmatpush.msrb.mxu1 %v1047_v17  ;;  %372 = vmatpush.msrb.mxu0 %v197_v8  ;;  %v1334_v17 = vand.u32 4294901760, %v440_v53  ;;  %v438_v8 = vld [vmem:[#allocation8 + $0x10] sm:$0xff]  ;;  %v553_v23 = vand.u32 4294901760, %v1332_v37 }
  0x47   :  { %514 = vmatpush.msrb.mxu3 %v513_v18  ;;  %v1360_v18 = vand.u32 4294901760, %v438_v8  ;;  %v559_v3 = vand.u32 4294901760, %v1345_v47  ;;  %473 = vmatpush.msrb.mxu2 %v1310_v45 }
  0x48   :  { %413 = vmatpush.msrb.mxu1 %v1056_v20  ;;  %376 = vmatpush.msrb.mxu0 %v203_v34  ;;  %v542_v20 = vsub.f32 %v1299_v14, %v541_v11  ;;  %v531_v34 = vand.u32 4294901760, %v530_v28  ;;  %v1358_v22 = vsub.f32 %v440_v53, %v1334_v17  ;;  %v1371_v53 = vsub.f32 %v439_v63, %v1347_v15 }
  0x49   :  { %520 = vmatpush.msrb.mxu3 %v519_v5  ;;  %v1373_v5 = vand.u32 4294901760, %v437_v0  ;;  %v554_v29 = vsub.f32 %v1332_v37, %v553_v23  ;;  %475 = vmatpush.msrb.mxu2 %v1312_v56  ;;  %v1384_v63 = vsub.f32 %v438_v8, %v1360_v18  ;;  %v1386_v28 = vand.u32 4294901760, %v436_v12 }
  0x4a   :  { %415 = vmatpush.msrb.mxu1 %v1082_v32  ;;  %380 = vmatpush.msrb.mxu0 %v209_v38  ;;  %v537_v32 = vand.u32 4294901760, %v536_v57  ;;  %v548_v38 = vsub.f32 %v1325_v51, %v547_v42  ;;  %v560_v40 = vsub.f32 %v1345_v47, %v559_v3 }
  0x4b   :  { %526 = vmatpush.msrb.mxu3 %v525_v33  ;;  %v1397_v57 = vsub.f32 %v437_v0, %v1373_v5  ;;  %477 = vmatpush.msrb.mxu2 %v1318_v19  ;;  %v1407_v8 = vsub.f32 %v436_v12, %v1386_v28 }
  0x4c   :  { %417 = vmatpush.msrb.mxu1 %v1101_v44  ;;  %384 = vmatpush.msrb.mxu0 %v215_v48  ;;  %v543_v44 = vand.u32 4294901760, %v542_v20  ;;  %v565_v48 = vand.u32 4294901760, %v1358_v22 }
  0x4d   :  { %532 = vmatpush.msrb.mxu3 %v531_v34  ;;  %v583_v20 = vand.u32 4294901760, %v1397_v57  ;;  %479 = vmatpush.msrb.mxu2 %v1334_v17  ;;  %v589_v34 = vand.u32 4294901760, %v1407_v8 }
  0x4e   :  { %419 = vmatpush.msrb.mxu1 %v1106_v46  ;;  %388 = vmatpush.msrb.mxu0 %v221_v54  ;;  %v549_v46 = vand.u32 4294901760, %v548_v38  ;;  %v571_v54 = vand.u32 4294901760, %v1371_v53  ;;  %v566_v49 = vsub.f32 %v1358_v22, %v565_v48 }
  0x4f   :  { %538 = vmatpush.msrb.mxu3 %v537_v32  ;;  %481 = vmatpush.msrb.mxu2 %v1347_v15  ;;  %v584_v32 = vsub.f32 %v1397_v57, %v583_v20 }
  0x50   :  { %421 = vmatpush.msrb.mxu1 %v1118_v52  ;;  %392 = vmatpush.msrb.mxu0 %v227_v60  ;;  %v555_v52 = vand.u32 4294901760, %v554_v29  ;;  %v577_v60 = vand.u32 4294901760, %v1384_v63  ;;  %v572_v33 = vsub.f32 %v1371_v53, %v571_v54  ;;  %v567_v0 = vand.u32 4294901760, %v566_v49 }
  0x51   :  { %394 = vmatmul.f32.vlgmr.msrb.gmra.mxu0 %v1204_v1  ;;  %544 = vmatpush.msrb.mxu3 %v543_v44 }
  0x52   :  { %423 = vmatpush.msrb.mxu1 %v1130_v58  ;;  %600 = vmatpush.msra.mxu0 %v1248_v27  ;;  %v561_v58 = vand.u32 4294901760, %v560_v40 }
  0x53   :  { %550 = vmatpush.msrb.mxu3 %v549_v46  ;;  %483 = vmatpush.msrb.mxu2 %v1360_v18 }
  0x54   :  { %425 = vmatpush.msrb.mxu1 %v1135_v61  ;;  %603 = vmatpush.msra.mxu0 %v1251_v62  ;;  %v578_v61 = vsub.f32 %v1384_v63, %v577_v60 }
  0x55   :  { %556 = vmatpush.msrb.mxu3 %v555_v52  ;;  %485 = vmatpush.msrb.mxu2 %v1373_v5 }
  0x56   :  { %427 = vmatpush.msrb.mxu1 %v1144_v2  ;;  %606 = vmatpush.msra.mxu0 %v1254_v6  ;;  %v573_v2 = vand.u32 4294901760, %v572_v33  ;;  %v579_v12 = vand.u32 4294901760, %v578_v61 }
  0x57   :  { %562 = vmatpush.msrb.mxu3 %v561_v58  ;;  %487 = vmatpush.msrb.mxu2 %v1386_v28 }
  0x58   :  { %429 = vmatpush.msrb.mxu1 %v1166_v35  ;;  %609 = vmatpush.msra.mxu0 %v1259_v13  ;;  %v590_v35 = vsub.f32 %v1407_v8, %v589_v34 }
  0x59   :  { %431 = vmatmul.f32.vlgmr.msrb.gmra.mxu1 %v1204_v1  ;;  %568 = vmatpush.msrb.mxu3 %v567_v0  ;;  %v585_v1 = vand.u32 4294901760, %v584_v32 }
  0x5a   :  { %653 = vmatpush.msra.mxu1 %v1231_v43  ;;  %612 = vmatpush.msra.mxu0 %v1263_v4  ;;  %v591_v38 = vand.u32 4294901760, %v590_v35 }
  0x5b   :  { %574 = vmatpush.msrb.mxu3 %v573_v2  ;;  %694 = vmatpush.msra.mxu2 %v499_v25 }
  0x5c   :  { %655 = vmatpush.msra.mxu1 %v1233_v16  ;;  %615 = vmatpush.msra.mxu0 %v1276_v36 }
  0x5d   :  { %580 = vmatpush.msrb.mxu3 %v579_v12  ;;  %698 = vmatpush.msra.mxu2 %v505_v39 }
  0x5e   :  { %657 = vmatpush.msra.mxu1 %v1235_v24  ;;  %618 = vmatpush.msra.mxu0 %v1288_v41 }
  0x5f   :  { %586 = vmatpush.msrb.mxu3 %v585_v1  ;;  %702 = vmatpush.msra.mxu2 %v511_v21 }
  0x60   :  { %659 = vmatpush.msra.mxu1 %v1238_v26  ;;  %621 = vmatpush.msra.mxu0 %v1299_v14 }
  0x61   :  { %592 = vmatpush.msrb.mxu3 %v591_v38  ;;  %706 = vmatpush.msra.mxu2 %v517_v31 }
  0x62   :  { %661 = vmatpush.msra.mxu1 %v1240_v55  ;;  %624 = vmatpush.msra.mxu0 %v1325_v51 }
  0x63   :  { %761 = vmatpush.msra.mxu3 %v1231_v43  ;;  %710 = vmatpush.msra.mxu2 %v523_v9  ;;  %v843_v43 = vld [vmem:[%s1525_s2] ss:$0 sm:$0xff]  ;;  %s979_s2 = smov [#allocation10]  }
  0x64   :  { %663 = vmatpush.msra.mxu1 %v1242_v59  ;;  %627 = vmatpush.msra.mxu0 %v1332_v37  ;;  %s817_s13 = sshll.u32 %s979_s2, 4  ;;  %v844_v9 = vld [vmem:[%s1527_s4] ss:$0 sm:$0xff]  ;;  %s818_s13 = int_to_ptr.vmem [resolvable:$true] %s817_s13 }
  0x65   :  { %763 = vmatpush.msra.mxu3 %v1233_v16  ;;  %714 = vmatpush.msra.mxu2 %v529_v50 }
  0x66   :  { %665 = vmatpush.msra.mxu1 %v1256_v7  ;;  %630 = vmatpush.msra.mxu0 %v1345_v47 }
  0x67   :  { %765 = vmatpush.msra.mxu3 %v1235_v24  ;;  %718 = vmatpush.msra.mxu2 %v535_v10 }
  0x68   :  { %667 = vmatpush.msra.mxu1 %v1271_v30  ;;  %633 = vmatpush.msra.mxu0 %v1358_v22 }
  0x69   :  { %767 = vmatpush.msra.mxu3 %v1238_v26  ;;  %722 = vmatpush.msra.mxu2 %v541_v11 }
  0x6a   :  { %669 = vmatpush.msra.mxu1 %v1310_v45  ;;  %636 = vmatpush.msra.mxu0 %v1371_v53 }
  0x6b   :  { %769 = vmatpush.msra.mxu3 %v1240_v55  ;;  %726 = vmatpush.msra.mxu2 %v547_v42 }
  0x6c   :  { %671 = vmatpush.msra.mxu1 %v1312_v56  ;;  %639 = vmatpush.msra.mxu0 %v1384_v63 }
  0x6d   :  { %771 = vmatpush.msra.mxu3 %v1242_v59  ;;  %730 = vmatpush.msra.mxu2 %v553_v23 }
  0x6e   :  { %673 = vmatpush.msra.mxu1 %v1318_v19  ;;  %642 = vmatpush.msra.mxu0 %v1397_v57 }
  0x6f   :  { %773 = vmatpush.msra.mxu3 %v1256_v7  ;;  %734 = vmatpush.msra.mxu2 %v559_v3 }
  0x70   :  { %675 = vmatpush.msra.mxu1 %v1334_v17  ;;  %645 = vmatpush.msra.mxu0 %v1407_v8 }
  0x71   :  { %775 = vmatpush.msra.mxu3 %v1271_v30  ;;  %738 = vmatpush.msra.mxu2 %v565_v48 }
  0x72   :  { %677 = vmatpush.msra.mxu1 %v1347_v15 }
  0x73   :  { %777 = vmatpush.msra.mxu3 %v1310_v45  ;;  %742 = vmatpush.msra.mxu2 %v571_v54 }
  0x74   :  { %679 = vmatpush.msra.mxu1 %v1360_v18 }
  0x75   :  { %779 = vmatpush.msra.mxu3 %v1312_v56  ;;  %746 = vmatpush.msra.mxu2 %v577_v60 }
  0x76   :  { %681 = vmatpush.msra.mxu1 %v1373_v5 }
  0x77   :  { %781 = vmatpush.msra.mxu3 %v1318_v19  ;;  %750 = vmatpush.msra.mxu2 %v583_v20 }
  0x78   :  { %683 = vmatpush.msra.mxu1 %v1386_v28 }
  0x79   :  { %783 = vmatpush.msra.mxu3 %v1334_v17  ;;  %754 = vmatpush.msra.mxu2 %v589_v34 }
  0x7b   :  { %785 = vmatpush.msra.mxu3 %v1347_v15 }
  0x7d   :  { %787 = vmatpush.msra.mxu3 %v1360_v18 }
  0x7f   :  { %789 = vmatpush.msra.mxu3 %v1373_v5 }
  0x81   :  { %791 = vmatpush.msra.mxu3 %v1386_v28 }
  0xb2   :  { %v132_v16 = vpop.f32.mrf.mxu0 }
  0xb3   :  { %v133_v24 = vadd.f32 %v843_v43, %v132_v16 }
  0xb6   :  { %v233_v26 = vpop.f32.mrf.mxu1  ;;  %v326_v62 = vpop.f32.mrf.mxu3 }
  0xb7   :  { %v234_v55 = vadd.f32 %v233_v26, %v133_v24 }
  0xb8   :  { %v287_v59 = vpop.f32.mrf.mxu2 }
  0xb9   :  { %v288_v27 = vadd.f32 %v287_v59, %v234_v55 }
  0xbb   :  { %v327_v6 = vadd.f32 %v326_v62, %v288_v27 }
  0xce   :  { %v395_v7 = vpop.f32.mrf.mxu0 }
  0xcf   :  { %v396_v13 = vadd.f32 %v395_v7, %v327_v6 }
  0xd6   :  { %v432_v4 = vpop.f32.mrf.mxu1 }
  0xd7   :  { %v433_v25 = vadd.f32 %v432_v4, %v396_v13 }
  0xd9   :  { %v435_v39 = vmax.f32 %v433_v25, 0.0 }
  0xdb   :  { %v488_v21 = vand.u32 4294901760, %v435_v39  ;;  %798 = vst.msk [vmem:[#allocation10] sm:$0xff] %vm797_vm1, %v435_v39 }
  0xdc   :  { %822 = dma.vmem_to_hbm [thread:$0]  %s818_s13, 128, %s820_s16, [#allocation11]  }
  0xdd   :  { %v489_v30 = vsub.f32 %v435_v39, %v488_v21  ;;  %594 = vmatmul.f32.vlgmr.msrb.gmra.mxu3 %v488_v21 }
  0xdf   :  { %648 = vmatmul.f32.vlgmr.msra.gmra.mxu0 %v489_v30  ;;  %v490_v31 = vand.u32 4294901760, %v489_v30 }
  0xe1   :  { %687 = vmatmul.f32.vlgmr.msra.gmra.mxu1 %v490_v31  ;;  %v491_v36 = vsub.f32 %v489_v30, %v490_v31 }
  0xe3   :  { %v492_v41 = vand.u32 4294901760, %v491_v36 }
  0xe5   :  { %493 = vmatmul.f32.vlgmr.msrb.gmra.mxu2 %v492_v41  ;;  %793 = vmatmul.f32.vlgmr.msra.gmra.mxu3 %v488_v21 }
  0xed   :  { %756 = vmatmul.f32.vlgmr.msra.gmra.mxu2 %v488_v21 }
 0x15c   :  { %v649_v56 = vpop.f32.mrf.mxu0 }
 0x15e   :  { %v688_v11 = vpop.f32.mrf.mxu1 }
 0x160   :  { %v595_v14 = vpop.f32.mrf.mxu3 }
 0x168   :  { %v494_v50 = vpop.f32.mrf.mxu2  ;;  %v794_v42 = vpop.f32.mrf.mxu3 }
 0x169   :  { %v495_v10 = vadd.f32 %v844_v9, %v494_v50 }
 0x16b   :  { %v596_v45 = vadd.f32 %v595_v14, %v495_v10 }
 0x16d   :  { %v650_v19 = vadd.f32 %v649_v56, %v596_v45 }
 0x16f   :  { %v689_v51 = vadd.f32 %v688_v11, %v650_v19 }
 0x170   :  { %v757_v37 = vpop.f32.mrf.mxu2 }
 0x171   :  { %v758_v17 = vadd.f32 %v757_v37, %v689_v51 }
 0x173   :  { %v795_v47 = vadd.f32 %v794_v42, %v758_v17 }
 0x175   :  { %800 = vst.msk [vmem:[#allocation9] sm:$0xff] %vm799_vm2, %v795_v47 }
 0x176   :  { %811 = dma.vmem_to_hbm [thread:$0]  %s807_s20, 128, %s809_s22, [#allocation5]  }
 0x177   :  { %969 = dma.done.wait [#allocation5], 128  }
 0x178   :  { %970 = vsyncadd [#allocation5], 4294967168 }
 0x179   :  { %971 = dma.done.wait [#allocation11], 128  }
 0x17a   :  { %972 = vsyncadd [#allocation11], 4294967168 }
 0x17b   :  { %831 = vsyncpa [#allocation4], 1 }
 0x17c   :  { %832 = vsyncpa [#allocation7], 1 }
 0x17d   :  { %833 = vsyncpa [#allocation5], 1 }
 0x17e   :  { %834 = vsyncpa [#allocation11], 1 }

</bundles_post_ra>
